<compile_context>
chip_gen: v6e
topology: v6e:2x2x1
jax: 0.10.0
libtpu: 0.0.40
codegen_flags: <defaults>
</compile_context>

<pallas_src>
import jax
import jax.numpy as jnp
from jax.experimental import pallas as pl
from jax.experimental.pallas import tpu as pltpu

# ----------------------------- configuration -------------------------------
B = 2
IN_CHANS = 3                         # self.in_chans (default 3)
IMG = 16                             # input spatial size
PATCH = 4                            # encoder.patch_size
ENC_STRIDE = 4                       # encoder_stride (== patch so x_rec matches x)
NUM_FEATURES = 32                    # encoder.num_features
H_TOK = IMG // PATCH
W_TOK = IMG // PATCH
N_TOK = H_TOK * W_TOK
M_TOK = B * N_TOK                                   # 32 rows (multiple of 8)
PATCH_FEATS = IN_CHANS * PATCH * PATCH              # 48 = C*P*P (pixel-shuffle order)
DEC_OUT = ENC_STRIDE * ENC_STRIDE * 3               # 48 = Conv2d out_channels

VMEM_SPEC = pl.BlockSpec(memory_space=pltpu.MemorySpace.VMEM)
SMEM_SPEC = pl.BlockSpec(memory_space=pltpu.MemorySpace.SMEM)


# ------------------------------- fused kernel --------------------------------
def simmim_fused_kernel(patches_ref, mask_ref, we_ref, be_ref, mtok_ref,
                        wd_ref, bd_ref, loss_ref):
    # patches: (M_TOK, PATCH_FEATS) f32; mask: (M_TOK, 1) f32 (0/1 per token)
    patches = patches_ref[...]
    m = mask_ref[...]

    # --- encoder: patch embed (MXU, f32 operands, f32 accumulate) ---
    tok = jnp.dot(patches, we_ref[...],
                  preferred_element_type=jnp.float32) + be_ref[...]       # (M, F)

    # --- learnable mask-token substitution: single select, implicit broadcast ---
    z = jnp.where(m > 0.5, mtok_ref[...], tok)                            # (M, F)

    # --- decoder: 1x1 Conv2d over channels == per-token matmul (MXU) ---
    x_rec = jnp.dot(z, wd_ref[...],
                    preferred_element_type=jnp.float32) + bd_ref[...]     # (M, DEC_OUT)

    # --- masked L1 loss: reduce lanes first (XLU), then mask M scalars (VPU) ---
    row = jnp.sum(jnp.abs(patches - x_rec), axis=-1, keepdims=True)       # (M, 1)
    loss_ref[0, 0] = jnp.sum(row * m)


# ------------------------------- wrapper -------------------------------------
def simmim_forward(x, mask, params):
    x = x.astype(jnp.float32)
    mask_f = mask.astype(jnp.float32)

    # ---- patchify in PixelShuffle channel order (c, i, j) -- glue, pure layout ----
    xp = x.reshape(B, IN_CHANS, H_TOK, PATCH, W_TOK, PATCH)
    xp = xp.transpose(0, 2, 4, 1, 3, 5)                  # (B, Ht, Wt, C, P, P)
    patches = xp.reshape(M_TOK, PATCH_FEATS)             # col idx = c*P*P + i*P + j
    mask_flat = mask_f.reshape(M_TOK, 1)

    # ---- one fused Pallas call: encoder + decoder + masked-L1 partial sum ----
    # No HBM padding: full-array VMEM blocks; Mosaic pads the internal layout.
    loss_sum = pl.pallas_call(
        simmim_fused_kernel,
        out_shape=jax.ShapeDtypeStruct((1, 1), jnp.float32),
        in_specs=[VMEM_SPEC] * 7,
        out_specs=SMEM_SPEC,
    )(patches, mask_flat,
      params["w_embed"], params["b_embed"], params["mask_token"],
      params["w_dec"], params["b_dec"])

    # mask.repeat_interleave(P,1).repeat_interleave(P,2).sum() == mask.sum() * P*P
    mask_sum = jnp.sum(mask_f) * (PATCH * PATCH)
    loss = loss_sum[0, 0] / (mask_sum + 1e-5) / IN_CHANS
    return loss


def simmim_reference(x, mask, params):
    """Pure-JAX f32 reference of the same forward pass (full NCHW loss path)."""
    x = x.astype(jnp.float32)
    mask_f = mask.astype(jnp.float32)
    xp = x.reshape(B, IN_CHANS, H_TOK, PATCH, W_TOK, PATCH).transpose(0, 2, 4, 1, 3, 5)
    patches = xp.reshape(M_TOK, PATCH_FEATS)
    tok = patches @ params["w_embed"] + params["b_embed"]
    m = mask_f.reshape(M_TOK, 1)
    z = m * params["mask_token"] + (1.0 - m) * tok
    pre = z @ params["w_dec"] + params["b_dec"]
    pre = pre.reshape(B, H_TOK, W_TOK, 3, ENC_STRIDE, ENC_STRIDE)
    x_rec = pre.transpose(0, 3, 1, 4, 2, 5).reshape(B, 3, IMG, IMG)   # PixelShuffle
    mask_up = jnp.repeat(jnp.repeat(mask_f, PATCH, axis=1), PATCH, axis=2)[:, None]
    loss_recon = jnp.abs(x - x_rec)
    return jnp.sum(loss_recon * mask_up) / (jnp.sum(mask_up) + 1e-5) / IN_CHANS


# --------------------------------- main ---------------------------------------
if __name__ == "__main__":
    key = jax.random.PRNGKey(0)
    kx, km, k1, k2, k3, k4, k5 = jax.random.split(key, 7)

    x = jax.random.normal(kx, (B, IN_CHANS, IMG, IMG), jnp.float32)
    mask = (jax.random.uniform(km, (B, H_TOK, W_TOK)) > 0.5).astype(jnp.float32)

    params = {
        "w_embed": jax.random.normal(k1, (PATCH_FEATS, NUM_FEATURES), jnp.float32) * 0.02,
        "b_embed": jax.random.normal(k2, (1, NUM_FEATURES), jnp.float32) * 0.02,
        "mask_token": jax.random.normal(k3, (1, NUM_FEATURES), jnp.float32) * 0.02,
        "w_dec": jax.random.normal(k4, (NUM_FEATURES, DEC_OUT), jnp.float32) * 0.02,
        "b_dec": jax.random.normal(k5, (1, DEC_OUT), jnp.float32) * 0.02,
    }

    loss = jax.block_until_ready(jax.jit(simmim_forward)(x, mask, params))
    loss_ref = jax.block_until_ready(simmim_reference(x, mask, params))

    # All-f32 kernel path -> tight tolerance vs. the f32 reference.
    assert jnp.allclose(loss, loss_ref, rtol=1e-4, atol=1e-6), (loss, loss_ref)

    print("KERNEL_OK")
</pallas_src>

<mosaic_0001>
module attributes {stable_mosaic.version = 11 : i64} {
  func.func @simmim_fused_kernel(%arg0: memref<32x48xf32, #tpu.memory_space<vmem>>, %arg1: memref<32x1xf32, #tpu.memory_space<vmem>>, %arg2: memref<48x32xf32, #tpu.memory_space<vmem>>, %arg3: memref<1x32xf32, #tpu.memory_space<vmem>>, %arg4: memref<1x32xf32, #tpu.memory_space<vmem>>, %arg5: memref<32x48xf32, #tpu.memory_space<vmem>>, %arg6: memref<1x48xf32, #tpu.memory_space<vmem>>, %arg7: memref<1x1xf32, #tpu.memory_space<smem>>) attributes {dimension_semantics = [], scalar_prefetch = 0 : i64, scratch_operands = 0 : i64, tpu.core_type = #tpu.core_type<tc>} {
    %c0 = arith.constant 0 : index
    %c0_0 = arith.constant 0 : index
    %0 = vector.load %arg0[%c0, %c0_0] : memref<32x48xf32, #tpu.memory_space<vmem>>, vector<32x48xf32>
    %c0_1 = arith.constant 0 : index
    %c0_2 = arith.constant 0 : index
    %1 = vector.load %arg1[%c0_1, %c0_2] : memref<32x1xf32, #tpu.memory_space<vmem>>, vector<32x1xf32>
    %c0_3 = arith.constant 0 : index
    %c0_4 = arith.constant 0 : index
    %2 = vector.load %arg2[%c0_3, %c0_4] : memref<48x32xf32, #tpu.memory_space<vmem>>, vector<48x32xf32>
    %cst = arith.constant dense<0.000000e+00> : vector<32x32xf32>
    %3 = tpu.matmul %0, %2, %cst {dimension_numbers = #tpu.dot_dimension_numbers<[1], [0], [0], [1], [0, 0, 1, 1], [], []>} : vector<32x48xf32>, vector<48x32xf32>, vector<32x32xf32> -> vector<32x32xf32>
    %c0_5 = arith.constant 0 : index
    %c0_6 = arith.constant 0 : index
    %4 = vector.load %arg3[%c0_5, %c0_6] : memref<1x32xf32, #tpu.memory_space<vmem>>, vector<1x32xf32>
    %5 = vector.broadcast %4 : vector<1x32xf32> to vector<32x32xf32>
    %6 = arith.addf %3, %5 : vector<32x32xf32>
    %cst_7 = arith.constant 5.000000e-01 : f32
    %7 = vector.broadcast %cst_7 : f32 to vector<32x1xf32>
    %8 = arith.cmpf ogt, %1, %7 : vector<32x1xf32>
    %c0_8 = arith.constant 0 : index
    %c0_9 = arith.constant 0 : index
    %9 = vector.load %arg4[%c0_8, %c0_9] : memref<1x32xf32, #tpu.memory_space<vmem>>, vector<1x32xf32>
    %10 = vector.shape_cast %8 : vector<32x1xi1> to vector<32x1xi1>
    %11 = vector.broadcast %10 : vector<32x1xi1> to vector<32x32xi1>
    %12 = vector.shape_cast %9 : vector<1x32xf32> to vector<1x32xf32>
    %13 = vector.broadcast %12 : vector<1x32xf32> to vector<32x32xf32>
    %14 = arith.select %11, %13, %6 : vector<32x32xi1>, vector<32x32xf32>
    %c0_10 = arith.constant 0 : index
    %c0_11 = arith.constant 0 : index
    %15 = vector.load %arg5[%c0_10, %c0_11] : memref<32x48xf32, #tpu.memory_space<vmem>>, vector<32x48xf32>
    %cst_12 = arith.constant dense<0.000000e+00> : vector<32x48xf32>
    %16 = tpu.matmul %14, %15, %cst_12 {dimension_numbers = #tpu.dot_dimension_numbers<[1], [0], [0], [1], [0, 0, 1, 1], [], []>} : vector<32x32xf32>, vector<32x48xf32>, vector<32x48xf32> -> vector<32x48xf32>
    %c0_13 = arith.constant 0 : index
    %c0_14 = arith.constant 0 : index
    %17 = vector.load %arg6[%c0_13, %c0_14] : memref<1x48xf32, #tpu.memory_space<vmem>>, vector<1x48xf32>
    %18 = vector.broadcast %17 : vector<1x48xf32> to vector<32x48xf32>
    %19 = arith.addf %16, %18 : vector<32x48xf32>
    %20 = arith.subf %0, %19 : vector<32x48xf32>
    %21 = math.absf %20 : vector<32x48xf32>
    %cst_15 = arith.constant dense<0.000000e+00> : vector<32xf32>
    %22 = vector.multi_reduction <add>, %21, %cst_15 [1] : vector<32x48xf32> to vector<32xf32>
    %23 = vector.shape_cast %22 : vector<32xf32> to vector<32x1xf32>
    %24 = arith.mulf %23, %1 : vector<32x1xf32>
    %25 = vector.shape_cast %24 : vector<32x1xf32> to vector<1x32x1xf32>
    %cst_16 = arith.constant dense<0.000000e+00> : vector<1xf32>
    %26 = vector.multi_reduction <add>, %25, %cst_16 [1, 2] : vector<1x32x1xf32> to vector<1xf32>
    %27 = vector.shape_cast %26 : vector<1xf32> to vector<1x1x1xf32>
    %28 = vector.extract %27[0, 0, 0] : f32 from vector<1x1x1xf32>
    %c0_17 = arith.constant 0 : index
    %c0_18 = arith.constant 0 : index
    %29 = memref.load %arg7[%c0_17, %c0_18] : memref<1x1xf32, #tpu.memory_space<smem>>
    memref.store %28, %arg7[%c0_17, %c0_18] : memref<1x1xf32, #tpu.memory_space<smem>>
    return
  }
}

</mosaic_0001>

<bundles_post_ra>
// kernel: simmim_forward.1
= control target key start
LH: loop header
LB: loop body
LE: loop exit
PB: predicated region body
PF: predicated region fallthrough
CT: control target
= control target key end

     0   :  { %vm48_vm0 = vcmask 392192   ;;  %v423_v2 = vmov 0   ;;  %s563_s0 = inlined_call_operand.vmem [shape: f32[32,48], index: 0, kind: input, shape index: {}]   ;;  %s564_s1 = inlined_call_operand.vmem [shape: f32[32,1], index: 1, kind: input, shape index: {}]   ;;  %s565_s2 = inlined_call_operand.vmem [shape: f32[48,32], index: 2, kind: input, shape index: {}]   ;;  %s566_s3 = inlined_call_operand.vmem [shape: f32[1,32], index: 3, kind: input, shape index: {}]   ;;  %s567_s4 = inlined_call_operand.vmem [shape: f32[1,32], index: 4, kind: input, shape index: {}]   ;;  %s568_s5 = inlined_call_operand.vmem [shape: f32[32,48], index: 5, kind: input, shape index: {}]   ;;  %s569_s6 = inlined_call_operand.vmem [shape: f32[1,48], index: 6, kind: input, shape index: {}]   ;;  %s570_s7 = inlined_call_operand.hbm [shape: f32[1,1], index: 7, kind: output, shape index: {}]  }
   0x1   :  { %v40_v0 = vld [vmem:[%s565_s2 + $0x28] sm:$0xff]  ;;  %v39_v1 = vld [vmem:[%s565_s2 + $0x20] sm:$0xff]  ;;  %411 = vset.pattern.permute.xlu0 %v423_v2  ;;  %v38_v3 = vld [vmem:[%s565_s2 + $0x18] sm:$0xff]  ;;  %412 = vset.pattern.permute.xlu1 %v423_v2 }
   0x2   :  { %375 = vmatprep.subr.mxu0 %v40_v0  ;;  %v477_v4 = vld [vmem:[%s563_s0] sm:$0xff]  ;;  %v37_v5 = vld [vmem:[%s565_s2 + $0x10] sm:$0xff]  ;;  %v499_v8 = vld [vmem:[%s564_s1 + $0x8] sm:$0xff] }
   0x3   :  { %376 = vmatpush3.msra.mxu0 %v40_v0  ;;  %387 = vmatprep.mubr.msk.f32.mxu0 %vm48_vm0, %v477_v4  ;;  %v487_v6 = vld [vmem:[%s564_s1] sm:$0xff]  ;;  %v492_v7 = vld [vmem:[%s564_s1 + $0x10] sm:$0xff]  ;;  %v504_v9 = vld [vmem:[%s564_s1 + $0x18] sm:$0xff]  ;;  %vm147_vm3 = vcmp.gt.f32.partialorder %v499_v8, 0.5 }
   0x4   :  { %377 = vmatprep.subr.mxu0 %v39_v1  ;;  %vm146_vm1 = vcmp.gt.f32.partialorder %v487_v6, 0.5  ;;  %vm148_vm2 = vcmp.gt.f32.partialorder %v492_v7, 0.5  ;;  %v184_v10 = vld [vmem:[%s568_s5 + $0x18] sm:$0xff]  ;;  %vm149_vm4 = vcmp.gt.f32.partialorder %v504_v9, 0.5 }
   0x5   :  { %378 = vmatpush3.msra.mxu0 %v39_v1  ;;  %v151_v11 = vsel %vm146_vm1, 1, %v423_v2  ;;  %v153_v12 = vsel %vm148_vm2, 1, %v423_v2  ;;  %393 = vmatprep.subr.mxu1 %v184_v10 }
   0x6   :  { %379 = vmatprep.subr.mxu0 %v38_v3 }
   0x7   :  { %12 = vsyncpa [#allocation3], 0  ;;  %380 = vmatpush3.msra.mxu0 %v38_v3  ;;  %v36_v13 = vld [vmem:[%s565_s2 + $0x8] sm:$0xff]  ;;  %156 = vperm.xlu0 %411, %v151_v11   ;;  %v152_v14 = vsel %vm147_vm3, 1, %v423_v2  ;;  %v35_v15 = vld [vmem:[%s565_s2] sm:$0xff]  ;;  %v154_v16 = vsel %vm149_vm4, 1, %v423_v2 }
   0x8   :  { %381 = vmatprep.subr.mxu0 %v37_v5  ;;  %162 = vperm.xlu1 %412, %v153_v12   ;;  %v28_v17 = vld [vmem:[%s563_s0 + $0x8] sm:$0xff]  ;;  %v29_v18 = vld [vmem:[%s563_s0 + $0x10] sm:$0xff]  ;;  %v30_v19 = vld [vmem:[%s563_s0 + $0x18] sm:$0xff]  ;;  %vm192_vm6 = vcmask 261120   ;;  %vm314_vm10 = vcmask 7168  }
   0x9   :  { %382 = vmatpush3.msra.mxu0 %v37_v5  ;;  %394 = vmatpush3.msra.mxu1 %v184_v10  ;;  %v183_v20 = vld [vmem:[%s568_s5 + $0x10] sm:$0xff]  ;;  %v182_v21 = vld [vmem:[%s568_s5 + $0x8] sm:$0xff]  ;;  %v181_v22 = vld [vmem:[%s568_s5] sm:$0xff] }
   0xa   :  { %383 = vmatprep.subr.mxu0 %v36_v13  ;;  %395 = vmatprep.subr.mxu1 %v183_v20  ;;  %v346_v25 = vld [vmem:[%s566_s3] ss:$0 sm:$0xff] }
   0xb   :  { %384 = vmatpush3.msra.mxu0 %v36_v13  ;;  %159 = vperm.xlu0 %411, %v152_v14   ;;  %v351_v31 = vld [vmem:[%s567_s4] ss:$0 sm:$0xff] }
   0xc   :  { %385 = vmatprep.subr.mxu0 %v35_v15  ;;  %165 = vperm.xlu1 %412, %v154_v16   ;;  %v352_v41 = vld [vmem:[%s569_s6] ss:$0 sm:$0xff]  ;;  %s424_s6 = smov [#allocation2]  }
   0xd   :  { %386 = vmatpush3.msra.mxu0 %v35_v15  ;;  %396 = vmatpush3.msra.mxu1 %v183_v20 }
   0xe   :  { %388 = vmatmul.mubr.msk.f32.vlgmr.msra.gmra.mxu0 %vm48_vm0, %v28_v17  ;;  %397 = vmatprep.subr.mxu1 %v182_v21 }
   0xf   :  { %390 = vmatprep.mubr.msk.f32.mxu0 %vm48_vm0, %v29_v18  ;;  %398 = vmatpush3.msra.mxu1 %v182_v21 }
  0x10   :  { %399 = vmatprep.subr.mxu1 %v181_v22 }
  0x11   :  { %400 = vmatpush3.msra.mxu1 %v181_v22 }
  0x12   :  { %391 = vmatmul.mubr.msk.f32.gmra.mxu0 %vm48_vm0, %v30_v19 }
  0x82   :  { %v157_v23 = vpop.permute.xlu0 %156 }
  0x83   :  { %v163_v24 = vpop.permute.xlu1 %162  ;;  %vm167_vm7 = vcmp.eq.s32.totalorder %v157_v23, 1 }
  0x84   :  { %vm169_vm9 = vcmp.eq.s32.totalorder %v163_v24, 1 }
  0x86   :  { %v160_v26 = vpop.permute.xlu0 %159 }
  0x87   :  { %vm168_vm5 = vcmp.eq.s32.totalorder %v160_v26, 1  ;;  %v166_v32 = vpop.permute.xlu1 %165 }
  0x88   :  { %vm170_vm8 = vcmp.eq.s32.totalorder %v166_v32, 1 }
  0xce   :  { %v389_v27 = vpop.f32.mrf.mxu0 }
  0xcf   :  { %v133_v28 = vadd.f32 %v389_v27, %v346_v25 }
  0xd0   :  { %v127_v29 = vpop.f32.mrf.mxu0 }
  0xd1   :  { %v128_v30 = vadd.f32 %v346_v25, %v127_v29  ;;  %v178_v37 = vsel %vm168_vm5, %v351_v31, %v133_v28 }
  0xd2   :  { %v392_v33 = vpop.f32.mrf.mxu0 }
  0xd3   :  { %v177_v34 = vsel %vm167_vm7, %v351_v31, %v128_v30  ;;  %v143_v35 = vadd.f32 %v392_v33, %v346_v25 }
  0xd4   :  { %v137_v36 = vpop.f32.mrf.mxu0  ;;  %401 = vmatprep.mubr.msk.f32.mxu1 %vm192_vm6, %v177_v34 }
  0xd5   :  { %v138_v38 = vadd.f32 %v346_v25, %v137_v36  ;;  %402 = vmatmul.mubr.msk.f32.vlgmr.msra.gmra.mxu1 %vm192_vm6, %v178_v37  ;;  %v180_v40 = vsel %vm170_vm8, %v351_v31, %v143_v35 }
  0xd7   :  { %v179_v39 = vsel %vm169_vm9, %v351_v31, %v138_v38 }
  0xd8   :  { %404 = vmatprep.mubr.msk.f32.mxu1 %vm192_vm6, %v179_v39 }
  0xd9   :  { %405 = vmatmul.mubr.msk.f32.gmra.mxu1 %vm192_vm6, %v180_v40 }
 0x195   :  { %v403_v42 = vpop.f32.mrf.mxu1 }
 0x196   :  { %v277_v43 = vadd.f32 %v403_v42, %v352_v41 }
 0x197   :  { %v271_v44 = vpop.f32.mrf.mxu1 }
 0x198   :  { %v291_v45 = vsub.f32 %v28_v17, %v277_v43  ;;  %v272_v46 = vadd.f32 %v352_v41, %v271_v44 }
 0x199   :  { %v406_v47 = vpop.f32.mrf.mxu1 }
 0x19a   :  { %v290_v48 = vsub.f32 %v477_v4, %v272_v46  ;;  %v287_v49 = vadd.f32 %v406_v47, %v352_v41  ;;  %v295_v50 = vand.u32 2147483647, %v291_v45 }
 0x19b   :  { %v281_v51 = vpop.f32.mrf.mxu1 }
 0x19c   :  { %v282_v52 = vadd.f32 %v352_v41, %v281_v51  ;;  %v301_v53 = vsel %vm48_vm0, %v295_v50, 0.0  ;;  %v294_v54 = vand.u32 2147483647, %v290_v48  ;;  %v293_v55 = vsub.f32 %v30_v19, %v287_v49 }
 0x19d   :  { %302 = vadd.xlane.f32.xlu1 %v301_v53 }
 0x19e   :  { %v292_v56 = vsub.f32 %v29_v18, %v282_v52  ;;  %v298_v57 = vsel %vm48_vm0, %v294_v54, 0.0  ;;  %v297_v60 = vand.u32 2147483647, %v293_v55 }
 0x19f   :  { %299 = vadd.xlane.f32.xlu0 %v298_v57 }
 0x1a0   :  { %v296_v58 = vand.u32 2147483647, %v292_v56  ;;  %v307_v61 = vsel %vm48_vm0, %v297_v60, 0.0 }
 0x1a2   :  { %v304_v59 = vsel %vm48_vm0, %v296_v58, 0.0 }
 0x1a3   :  { %305 = vadd.xlane.f32.xlu0 %v304_v59 }
 0x1a7   :  { %308 = vadd.xlane.f32.xlu0 %v307_v61 }
 0x226   :  { %v303_v62 = vpop.xlane.xlu1 %302 }
 0x227   :  { %v311_v1 = vmul.f32 %v303_v62, %v499_v8 }
 0x228   :  { %v300_v63 = vpop.xlane.xlu0 %299 }
 0x229   :  { %v310_v0 = vmul.f32 %v300_v63, %v487_v6  ;;  %v316_v5 = vsel %vm314_vm10, %v311_v1, 0.0 }
 0x22b   :  { %v315_v3 = vsel %vm314_vm10, %v310_v0, 0.0 }
 0x22c   :  { %v306_v2 = vpop.xlane.xlu0 %305  ;;  %v317_v11 = vadd.f32 %v316_v5, %v315_v3 }
 0x22d   :  { %v312_v4 = vmul.f32 %v306_v2, %v492_v7 }
 0x22f   :  { %v318_v10 = vsel %vm314_vm10, %v312_v4, 0.0 }
 0x230   :  { %v309_v12 = vpop.xlane.xlu0 %308  ;;  %v319_v14 = vadd.f32 %v318_v10, %v317_v11 }
 0x231   :  { %v313_v13 = vmul.f32 %v309_v12, %v504_v9 }
 0x233   :  { %v320_v15 = vsel %vm314_vm10, %v313_v13, 0.0 }
 0x234   :  { %v321_v16 = vadd.f32 %v320_v15, %v319_v14 }
 0x236   :  { %322 = vadd.xlane.f32.xlu1 %v321_v16 }
 0x2bf   :  { %v323_v17 = vpop.xlane.xlu1 %322 }
 0x2c0   :  { %v324_v18 = vrot.slane %v323_v17, 4 }
 0x2c2   :  { %v325_v6 = vadd.f32 %v324_v18, %v323_v17 }
 0x2c4   :  { %v326_v19 = vrot.slane %v325_v6, 2 }
 0x2c6   :  { %v327_v8 = vadd.f32 %v326_v19, %v325_v6 }
 0x2c8   :  { %v328_v20 = vrot.slane %v327_v8, 1 }
 0x2ca   :  { %v329_v21 = vadd.f32 %v328_v20, %v327_v8 }
 0x2cc   :  { %407 = vpush %v329_v21 }
 0x2fd   :  { %s408_s5 = spop %407 }
 0x2fe   :  { %332 = sst [smem:[#allocation2]] %s408_s5 }
 0x2ff   :  { %340 = dma.smem_to_hbm %s424_s6, 16, %s570_s7, [#allocation3]  }
 0x300   :  { %421 = dma.done.wait [#allocation3], 16  }
 0x301   :  { %422 = vsyncadd [#allocation3], 4294967280 }
 0x302   :  { %344 = sfence }
 0x303   :  { %345 = vsyncpa [#allocation3], 1 }

</bundles_post_ra>
